<compile_context>
chip_gen: v5e
topology: v5e:2x2
jax: 0.10.0
libtpu: 0.0.40
codegen_flags: <defaults>
</compile_context>

<pallas_src>
import functools

import jax
import jax.numpy as jnp
from jax.experimental import pallas as pl
from jax.experimental.pallas import tpu as pltpu


def _round_up(x, m):
    return ((x + m - 1) // m) * m


# ---------------------------------------------------------------------------
# Fused kernel: out = adj @ x @ W + b  for a block of BB batches
# ---------------------------------------------------------------------------
def _graph_conv_kernel(x_ref, adj_ref, w_ref, b_ref, o_ref, *, reassociate):
    # x_ref:   (BB, N, D_in) f32
    # adj_ref: (BB, N, N)    f32/bf16
    # w_ref:   (D_in, Dp)    f32
    # b_ref:   (1, Dp)       f32
    # o_ref:   (BB, N, Dp)   f32
    adj = adj_ref[...].astype(jnp.float32)   # exact for {0,1}; f32 accumulate
    x = x_ref[...]
    w = w_ref[...]
    if reassociate:
        # adj @ (x @ W): cheaper when Dp < D_in.
        xw = jnp.einsum("bni,io->bno", x, w,
                        preferred_element_type=jnp.float32)
        y = jnp.einsum("bnm,bmo->bno", adj, xw,
                       preferred_element_type=jnp.float32)
    else:
        # (adj @ x) @ W: the module's original association.
        ax = jnp.einsum("bnm,bmi->bni", adj, x,
                        preferred_element_type=jnp.float32)
        y = jnp.einsum("bni,io->bno", ax, w,
                       preferred_element_type=jnp.float32)
    o_ref[...] = (y + b_ref[...]).astype(o_ref.dtype)
    # TODO(synk): for very large N (esp. v7x 64 MiB VMEM) add row/contraction
    # tiling of adj with a pltpu.VMEM accumulator instead of whole-N blocks.


def _pick_bb(B, N, D_in, Dp, adj_itemsize):
    """Largest divisor of B (<=8) whose per-step working set fits ~28 MiB."""
    w_bytes = D_in * Dp * 4 + Dp * 4
    budget = 28 * 1024 * 1024
    for cand in range(min(B, 8), 0, -1):
        per_step = cand * (N * N * adj_itemsize        # adj block
                           + N * D_in * 4              # x block
                           + N * Dp * 4)               # out block
        inter = cand * N * max(D_in, Dp) * 4           # matmul intermediate
        total = 2 * per_step + inter + w_bytes         # x2 = double buffering
        if B % cand == 0 and total <= budget:
            return cand
    return 1


def graph_conv(x, adj, weight, bias, *, adj_in_bf16=True):
    """Pallas implementation of GraphConv.forward.

    x:      (B, N, D_in)
    adj:    (B, N, N)
    weight: (D_in, D_out)
    bias:   (D_out,) or None
    returns (B, N, D_out)
    """
    B, N, D_in = x.shape
    D_out = weight.shape[1]
    Dp = _round_up(D_out, 128)            # lane-dense output width
    reassociate = Dp < D_in               # static order choice

    if bias is None:
        bias = jnp.zeros((D_out,), dtype=jnp.float32)
    w_pad = jnp.pad(weight.astype(jnp.float32), ((0, 0), (0, Dp - D_out)))
    b_pad = jnp.pad(bias.astype(jnp.float32), (0, Dp - D_out)).reshape(1, Dp)
    x_f32 = x.astype(jnp.float32)

    if adj_in_bf16:
        # Exact for {0,1} adjacencies; halves the dominant HBM traffic.
        # Pass adj_in_bf16=False for weighted / normalized adjacencies.
        adj = adj.astype(jnp.bfloat16)
    else:
        adj = adj.astype(jnp.float32)
    adj_itemsize = jnp.dtype(adj.dtype).itemsize

    BB = _pick_bb(B, N, D_in, Dp, adj_itemsize)

    if reassociate:
        flops = 2 * B * N * D_in * Dp + 2 * B * N * N * Dp
    else:
        flops = 2 * B * N * N * D_in + 2 * B * N * D_in * Dp
    cost = pl.CostEstimate(
        flops=flops,
        transcendentals=0,
        bytes_accessed=(B * N * N * adj_itemsize + B * N * D_in * 4
                        + D_in * Dp * 4 + Dp * 4 + B * N * Dp * 4),
    )

    kernel = functools.partial(_graph_conv_kernel, reassociate=reassociate)

    out_pad = pl.pallas_call(
        kernel,
        out_shape=jax.ShapeDtypeStruct((B, N, Dp), jnp.float32),
        grid_spec=pltpu.PrefetchScalarGridSpec(
            num_scalar_prefetch=0,
            grid=(B // BB,),
            in_specs=[
                pl.BlockSpec((BB, N, D_in), lambda i: (i, 0, 0)),  # x
                pl.BlockSpec((BB, N, N), lambda i: (i, 0, 0)),     # adj
                pl.BlockSpec((D_in, Dp), lambda i: (0, 0)),        # W (resident)
                pl.BlockSpec((1, Dp), lambda i: (0, 0)),           # bias
            ],
            out_specs=pl.BlockSpec((BB, N, Dp), lambda i: (i, 0, 0)),
        ),
        compiler_params=pltpu.CompilerParams(
            dimension_semantics=("parallel",),
            vmem_limit_bytes=48 * 1024 * 1024,
        ),
        cost_estimate=cost,
    )(x_f32, adj, w_pad, b_pad)

    return out_pad[:, :, :D_out].astype(x.dtype)


if __name__ == "__main__":
    # Small deterministic shapes consistent with the module.
    B, N, D_in, D_out = 2, 16, 32, 64

    key = jax.random.PRNGKey(0)
    kx, kadj, kw, kb = jax.random.split(key, 4)

    x = jax.random.normal(kx, (B, N, D_in), dtype=jnp.float32)
    # Symmetric 0/1 adjacency with self loops (typical graph input; exact bf16).
    a = (jax.random.uniform(kadj, (B, N, N)) > 0.5).astype(jnp.float32)
    adj = jnp.clip(a + jnp.transpose(a, (0, 2, 1)) + jnp.eye(N)[None], 0.0, 1.0)

    weight = jax.random.normal(kw, (D_in, D_out), dtype=jnp.float32) * 0.1
    bias = jax.random.normal(kb, (D_out,), dtype=jnp.float32) * 0.1

    out = graph_conv(x, adj, weight, bias)
    out = jax.block_until_ready(out)

    # Reference check (f32 end-to-end, original association order).
    ref = jnp.einsum("bnm,bmd->bnd", adj, x) @ weight + bias
    assert out.shape == (B, N, D_out)
    assert jnp.allclose(out, ref, atol=1e-4, rtol=1e-4), float(
        jnp.max(jnp.abs(out - ref))
    )

    print("KERNEL_OK")
</pallas_src>

<mosaic_0001>
module attributes {stable_mosaic.version = 11 : i64} {
  func.func @_graph_conv_kernel(%arg0: i32, %arg1: memref<2x16x32xf32, #tpu.memory_space<vmem>>, %arg2: memref<2x16x16xbf16, #tpu.memory_space<vmem>>, %arg3: memref<32x128xf32, #tpu.memory_space<vmem>>, %arg4: memref<1x128xf32, #tpu.memory_space<vmem>>, %arg5: memref<2x16x128xf32, #tpu.memory_space<vmem>>) attributes {dimension_semantics = [#tpu.dimension_semantics<parallel>], iteration_bounds = array<i64: 1>, scalar_prefetch = 0 : i64, scratch_operands = 0 : i64, tpu.core_type = #tpu.core_type<tc>, window_params = [{transform_indices = @transform_0, window_bounds = array<i64: 2, 16, 32>}, {transform_indices = @transform_1, window_bounds = array<i64: 2, 16, 16>}, {pipeline_mode = #tpu.pipeline_mode<synchronous>, transform_indices = @transform_2, window_bounds = array<i64: 32, 128>}, {pipeline_mode = #tpu.pipeline_mode<synchronous>, transform_indices = @transform_3, window_bounds = array<i64: 1, 128>}, {transform_indices = @transform_4, window_bounds = array<i64: 2, 16, 128>}]} {
    %c0 = arith.constant 0 : index
    %c0_0 = arith.constant 0 : index
    %c0_1 = arith.constant 0 : index
    %0 = vector.load %arg2[%c0, %c0_0, %c0_1] : memref<2x16x16xbf16, #tpu.memory_space<vmem>>, vector<2x16x16xbf16>
    %1 = arith.extf %0 : vector<2x16x16xbf16> to vector<2x16x16xf32>
    %c0_2 = arith.constant 0 : index
    %c0_3 = arith.constant 0 : index
    %c0_4 = arith.constant 0 : index
    %2 = vector.load %arg1[%c0_2, %c0_3, %c0_4] : memref<2x16x32xf32, #tpu.memory_space<vmem>>, vector<2x16x32xf32>
    %c0_5 = arith.constant 0 : index
    %c0_6 = arith.constant 0 : index
    %3 = vector.load %arg3[%c0_5, %c0_6] : memref<32x128xf32, #tpu.memory_space<vmem>>, vector<32x128xf32>
    "tpu.trace_start"() <{level = 10 : i32, message = "bnm,bmi->bni"}> : () -> ()
    %cst = arith.constant dense<0.000000e+00> : vector<2x16x32xf32>
    %4 = tpu.matmul %1, %2, %cst {dimension_numbers = #tpu.dot_dimension_numbers<[2], [1], [1], [2], [0, 0, 0, 1, 1, 2], [0], [0]>} : vector<2x16x16xf32>, vector<2x16x32xf32>, vector<2x16x32xf32> -> vector<2x16x32xf32>
    "tpu.trace_stop"() : () -> ()
    "tpu.trace_start"() <{level = 10 : i32, message = "bni,io->bno"}> : () -> ()
    %cst_7 = arith.constant dense<0.000000e+00> : vector<2x16x128xf32>
    %5 = tpu.matmul %4, %3, %cst_7 {dimension_numbers = #tpu.dot_dimension_numbers<[2], [0], [0, 1], [1], [0, 0, 0, 1, 1, 1], [], []>} : vector<2x16x32xf32>, vector<32x128xf32>, vector<2x16x128xf32> -> vector<2x16x128xf32>
    "tpu.trace_stop"() : () -> ()
    %c0_8 = arith.constant 0 : index
    %c0_9 = arith.constant 0 : index
    %6 = vector.load %arg4[%c0_8, %c0_9] : memref<1x128xf32, #tpu.memory_space<vmem>>, vector<1x128xf32>
    %7 = vector.shape_cast %6 : vector<1x128xf32> to vector<1x1x128xf32>
    %8 = vector.broadcast %7 : vector<1x1x128xf32> to vector<2x16x128xf32>
    %9 = arith.addf %5, %8 : vector<2x16x128xf32>
    %c0_10 = arith.constant 0 : index
    %c0_11 = arith.constant 0 : index
    %c0_12 = arith.constant 0 : index
    %10 = vector.load %arg5[%c0_10, %c0_11, %c0_12] : memref<2x16x128xf32, #tpu.memory_space<vmem>>, vector<2x16x128xf32>
    tpu.vector_store %arg5[%c0_10, %c0_11, %c0_12], %9 {strides = array<i32>} : memref<2x16x128xf32, #tpu.memory_space<vmem>>, vector<2x16x128xf32>,
    return
  }
  func.func @transform_0(%arg0: i32) -> (i32, i32, i32) {
    %c0_i32 = arith.constant 0 : i32
    %c0_i32_0 = arith.constant 0 : i32
    %c0_i32_1 = arith.constant 0 : i32
    return %arg0, %c0_i32, %c0_i32_0 : i32, i32, i32
  }
  func.func @transform_1(%arg0: i32) -> (i32, i32, i32) {
    %c0_i32 = arith.constant 0 : i32
    %c0_i32_0 = arith.constant 0 : i32
    %c0_i32_1 = arith.constant 0 : i32
    return %arg0, %c0_i32, %c0_i32_0 : i32, i32, i32
  }
  func.func @transform_2(%arg0: i32) -> (i32, i32) {
    %c0_i32 = arith.constant 0 : i32
    %c0_i32_0 = arith.constant 0 : i32
    %c0_i32_1 = arith.constant 0 : i32
    return %c0_i32, %c0_i32_0 : i32, i32
  }
  func.func @transform_3(%arg0: i32) -> (i32, i32) {
    %c0_i32 = arith.constant 0 : i32
    %c0_i32_0 = arith.constant 0 : i32
    %c0_i32_1 = arith.constant 0 : i32
    return %c0_i32, %c0_i32_0 : i32, i32
  }
  func.func @transform_4(%arg0: i32) -> (i32, i32, i32) {
    %c0_i32 = arith.constant 0 : i32
    %c0_i32_0 = arith.constant 0 : i32
    %c0_i32_1 = arith.constant 0 : i32
    return %arg0, %c0_i32, %c0_i32_0 : i32, i32, i32
  }
}

</mosaic_0001>

<bundles_post_ra>
// kernel: tpu_custom_call.1
= control target key start
LH: loop header
LB: loop body
LE: loop exit
PB: predicated region body
PF: predicated region fallthrough
CT: control target
= control target key end

     0   :  { %9 = vsyncpa [#allocation3], 0  ;;  %s403_s0 = inlined_call_operand.hbm [shape: f32[2,16,32], index: 0, kind: input, shape index: {}]   ;;  %s404_s1 = inlined_call_operand.hbm [shape: bf16[2,16,16], index: 1, kind: input, shape index: {}]   ;;  %s405_s2 = inlined_call_operand.hbm [shape: f32[32,128], index: 2, kind: input, shape index: {}]   ;;  %s406_s3 = inlined_call_operand.vmem [shape: f32[1,128], index: 3, kind: input, shape index: {}]   ;;  %s407_s4 = inlined_call_operand.hbm [shape: f32[2,16,128], index: 4, kind: output, shape index: {}]  }
   0x1   :  { %10 = vsyncpa [#allocation6], 0  ;;  %s29_s17 = sshll.u32 %s404_s1, 4  ;;  %s30_s17 = int_to_ptr.hbm [resolvable:$true] %s29_s17 }
   0x2   :  { %11 = vsyncpa [#allocation4], 0  ;;  %s342_s18 = smov [#allocation5]   ;;  %s16_s22 = sshll.u32 %s403_s0, 4  ;;  %s17_s22 = int_to_ptr.hbm [resolvable:$true] %s16_s22 }
   0x3   :  { %s31_s19 = sshll.u32 %s342_s18, 4  ;;  %s343_s23 = smov 64   ;;  %s32_s19 = int_to_ptr.vmem [resolvable:$true] %s31_s19 }
   0x4   :  { %s344_s24 = smov 4   ;;  %s345_s25 = smov [#allocation2]  }
   0x5   :  { %37 = dma.hbm_to_vmem [thread:$0]  %s30_s17, 256, %s32_s19, [#allocation6], %s343_s23, %s343_s23, %s344_s24  }
   0x6   :  { %s18_s26 = sshll.u32 %s345_s25, 4  ;;  %s346_s27 = smov 128   ;;  %s19_s26 = int_to_ptr.vmem [resolvable:$true] %s18_s26 }
   0x7   :  { %s347_s28 = smov 8   ;;  %s42_s30 = sshll.u32 %s405_s2, 4  ;;  %s43_s30 = int_to_ptr.hbm [resolvable:$true] %s42_s30 }
   0x8   :  { %24 = dma.hbm_to_vmem [thread:$0]  %s17_s22, 512, %s19_s26, [#allocation3], %s346_s27, %s346_s27, %s347_s28  }
   0x9   :  { %s348_s5 = smov [#allocation7]  }
   0xa   :  { %s44_s0 = sshll.u32 %s348_s5, 4  ;;  %s45_s0 = int_to_ptr.vmem [resolvable:$true] %s44_s0 }
   0xb   :  { %50 = dma.hbm_to_vmem [thread:$0]  %s43_s30, 512, %s45_s0, [#allocation6], %s346_s27, %s346_s27, %s347_s28  }
   0xc   :  { %336 = dma.done.wait [#allocation3], 512  }
   0xd   :  { %337 = vsyncadd [#allocation3], 4294966784 }
   0xe   :  { %338 = dma.done.wait [#allocation6], 768  }
   0xf   :  { %339 = vsyncadd [#allocation6], 4294966528  ;;  %v74_v0 = vld [vmem:[#allocation2 + $0x8] sm:$0xff]  ;;  %v76_v1 = vld [vmem:[#allocation2 + $0x18] sm:$0xff]  ;;  %vm81_vm0 = vcmask 130048   ;;  %vm144_vm1 = vcmask 261120  }
  0x10   :  { %v73_v2 = vld [vmem:[#allocation2] sm:$0xff]  ;;  %102 = vmatpush.msra.mxu0 %v74_v0  ;;  %131 = vmatpush.msra.mxu1 %v76_v1  ;;  %v75_v3 = vld [vmem:[#allocation2 + $0x10] sm:$0xff]  ;;  %v226_v5 = vld [vmem:[#allocation5 + $0x8] sm:$0xff]   ;;  %s349_s7 = smov [#allocation8]   ;;  %s196_s11 = sshll.u32 %s407_s4, 4  ;;  %s197_s11 = int_to_ptr.hbm [resolvable:$true] %s196_s11 }
  0x11   :  { %v219_v4 = vld [vmem:[#allocation5] sm:$0xff]   ;;  %v224_v7 = vunpack.c.l.bf16 %v226_v5  ;;  %v80_v8 = vld [vmem:[#allocation7 + $0x18] sm:$0xff]  ;;  %v78_v10 = vld [vmem:[#allocation7 + $0x8] sm:$0xff]  ;;  %v225_v12 = vunpack.c.h.bf16 %v226_v5  ;;  %s194_s8 = sshll.u32 %s349_s7, 4  ;;  %s195_s8 = int_to_ptr.vmem [resolvable:$true] %s194_s8 }
  0x12   :  { %v220_v6 = vunpack.c.l.bf16 %v219_v4  ;;  %103 = vmatpush.msra.mxu0 %v73_v2  ;;  %132 = vmatpush.msra.mxu1 %v75_v3  ;;  %v79_v9 = vld [vmem:[#allocation7 + $0x10] sm:$0xff]  ;;  %v221_v11 = vunpack.c.h.bf16 %v219_v4  ;;  %v77_v13 = vld [vmem:[#allocation7] sm:$0xff] }
  0x13   :  { %212 = vmatmul.msk.f32.vlgmr.msra.gmra.mxu1 %vm81_vm0, %v224_v7  ;;  %169 = vmatpush.msra.mxu2 %v80_v8  ;;  %v239_v18 = vld [vmem:[%s406_s3] ss:$0 sm:$0xff] }
  0x14   :  { %210 = vmatmul.msk.f32.vlgmr.msra.gmra.mxu0 %vm81_vm0, %v220_v6  ;;  %227 = vmatpush.msra.mxu3 %v80_v8 }
  0x15   :  { %170 = vmatpush.msra.mxu2 %v79_v9 }
  0x16   :  { %228 = vmatpush.msra.mxu3 %v79_v9 }
  0x17   :  { %171 = vmatpush.msra.mxu2 %v78_v10 }
  0x18   :  { %229 = vmatpush.msra.mxu3 %v78_v10 }
  0x19   :  { %172 = vmatpush.msra.mxu2 %v77_v13 }
  0x1a   :  { %230 = vmatpush.msra.mxu3 %v77_v13 }
  0x1b   :  { %213 = vmatmul.msk.f32.gmra.mxu1 %vm81_vm0, %v225_v12 }
  0x1c   :  { %211 = vmatmul.msk.f32.gmra.mxu0 %vm81_vm0, %v221_v11 }
  0x90   :  { %v134_v15 = vpop.f32.mrf.mxu1 }
  0x91   :  { %v105_v14 = vpop.f32.mrf.mxu0  ;;  %216 = vmatmul.msk.f32.vlgmr.msra.gmra.mxu3 %vm144_vm1, %v134_v15 }
  0x92   :  { %214 = vmatmul.msk.f32.vlgmr.msra.gmra.mxu2 %vm144_vm1, %v105_v14 }
  0x98   :  { %v137_v17 = vpop.f32.mrf.mxu1 }
  0x99   :  { %v108_v16 = vpop.f32.mrf.mxu0  ;;  %217 = vmatmul.msk.f32.gmra.mxu3 %vm144_vm1, %v137_v17 }
  0x9a   :  { %215 = vmatmul.msk.f32.gmra.mxu2 %vm144_vm1, %v108_v16 }
 0x114   :  { %v180_v20 = vpop.f32.mrf.mxu3 }
 0x115   :  { %v174_v19 = vpop.f32.mrf.mxu2  ;;  %v181_v22 = vadd.f32 %v239_v18, %v180_v20 }
 0x116   :  { %v175_v21 = vadd.f32 %v239_v18, %v174_v19 }
 0x117   :  { %188 = vst [vmem:[#allocation8 + $0x10] sm:$0xff] %v181_v22 }
 0x118   :  { %186 = vst [vmem:[#allocation8] sm:$0xff] %v175_v21 }
 0x11c   :  { %v183_v24 = vpop.f32.mrf.mxu3 }
 0x11d   :  { %v177_v23 = vpop.f32.mrf.mxu2  ;;  %v184_v26 = vadd.f32 %v239_v18, %v183_v24 }
 0x11e   :  { %v178_v25 = vadd.f32 %v239_v18, %v177_v23 }
 0x11f   :  { %189 = vst [vmem:[#allocation8 + $0x18] sm:$0xff] %v184_v26 }
 0x120   :  { %187 = vst [vmem:[#allocation8 + $0x8] sm:$0xff] %v178_v25 }
 0x121   :  { %202 = dma.vmem_to_hbm [thread:$0]  %s195_s8, 512, %s197_s11, [#allocation4], %s346_s27, %s346_s27, %s347_s28  }
 0x122   :  { %340 = dma.done.wait [#allocation4], 512  }
 0x123   :  { %341 = vsyncadd [#allocation4], 4294966784 }
 0x124   :  { %207 = vsyncpa [#allocation3], 1 }
 0x125   :  { %208 = vsyncpa [#allocation6], 1 }
 0x126   :  { %209 = vsyncpa [#allocation4], 1 }

</bundles_post_ra>
